<compile_context>
chip_gen: v6e
topology: v6e:2x2x1
jax: 0.10.0
libtpu: 0.0.40
codegen_flags: <defaults>
</compile_context>

<pallas_src>
import functools

import jax
import jax.numpy as jnp
from jax import lax
from jax.experimental import pallas as pl
from jax.experimental.pallas import tpu as pltpu

EPS = 1e-5  # PyTorch LayerNorm default eps


def _round_up(x, m):
    return ((x + m - 1) // m) * m


def _layernorm(h, gamma, beta):
    # Single pass: var = E[x^2] - mu^2 (two cross-lane reduces issued together).
    mu = jnp.mean(h, axis=-1, keepdims=True)
    ms = jnp.mean(h * h, axis=-1, keepdims=True)
    var = ms - mu * mu
    return (h - mu) * lax.rsqrt(var + EPS) * gamma + beta


def client_payment_kernel(
    # scalar prefetch (SMEM)
    ids_ref,                                  # (B_pad,) int32
    # inputs
    feats_ref,                                # VMEM (TM, n_feat)
    emb_proj_hbm,                             # ANY  (num_clients, E) == embed @ Wp_emb
    wp_feat_ref, bp_ref,                      # (n_feat, E), (1, E)
    wvo_ref, bvo_ref,                         # (L, E, E), (L, 1, E)   folded attention
    ln1g_ref, ln1b_ref,                       # (L, 1, E)
    w1_ref, b1_ref, w2_ref, b2_ref,           # (L, E, ff), (L,1,ff), (L,ff,E), (L,1,E)
    ln2g_ref, ln2b_ref,                       # (L, 1, E)
    wa_ref, ba_ref,                           # (E, half), (1, half)
    wb_ref, bb_ref,                           # (1, half), (1, 1)
    # output
    out_ref,                                  # VMEM (TM, 1)
    # scratch
    emb_buf, sem,                             # VMEM (TM, E), DMA sem (1,)
    *, num_layers, tm,
):
    base = pl.program_id(0) * tm

    # ---- gather projected client embeddings straight from HBM (O(TM*E) bytes) ----
    @pl.loop(0, tm)
    def _(r):
        idx = ids_ref[base + r]
        pltpu.make_async_copy(
            emb_proj_hbm.at[pl.ds(idx, 1), :],
            emb_buf.at[pl.ds(r, 1), :],
            sem.at[0],
        ).start()

    # Feature half of the projection overlaps with the gather DMAs.
    h_feat = (jnp.dot(feats_ref[...], wp_feat_ref[...],
                      preferred_element_type=jnp.float32)
              + bp_ref[...])                               # (TM, E)

    # All copies target one DMA semaphore (byte-counting): TM waits of (1, E)
    # each drain exactly the bytes the TM starts signal.
    @pl.loop(0, tm)
    def _(r):
        pltpu.make_async_copy(
            emb_proj_hbm.at[pl.ds(0, 1), :],
            emb_buf.at[pl.ds(r, 1), :],
            sem.at[0],
        ).wait()

    h = h_feat + emb_buf[...]                              # (TM, E)

    # ---- transformer encoder, seq_len == 1, post-LN, ReLU FFN ----
    for l in range(num_layers):
        # softmax over one key == 1  =>  attn = h @ (Wv Wo) + (bv Wo + bo)
        attn = (jnp.dot(h, wvo_ref[l], preferred_element_type=jnp.float32)
                + bvo_ref[l])
        h = _layernorm(h + attn, ln1g_ref[l], ln1b_ref[l])

        ff = jnp.maximum(
            jnp.dot(h, w1_ref[l], preferred_element_type=jnp.float32) + b1_ref[l],
            0.0)
        ff = jnp.dot(ff, w2_ref[l], preferred_element_type=jnp.float32) + b2_ref[l]
        h = _layernorm(h + ff, ln2g_ref[l], ln2b_ref[l])

    # ---- output head: Linear -> ReLU -> (Dropout: identity) -> Linear(half,1) ----
    o = jnp.maximum(
        jnp.dot(h, wa_ref[...], preferred_element_type=jnp.float32) + ba_ref[...],
        0.0)                                               # (TM, half)
    # (half -> 1) Linear as a lane reduction on the VPU/XLU (no N=1 MXU matmul).
    out_ref[...] = jnp.sum(o * wb_ref[...], axis=-1, keepdims=True) + bb_ref[...]


def init_params(key, *, input_dim, embed_dim, num_layers, num_clients):
    n_feat = input_dim - 1
    ff = 4 * embed_dim
    half = embed_dim // 2
    keys = iter(jax.random.split(key, 32))

    def w(shape, s=0.05):
        return jax.random.normal(next(keys), shape, jnp.float32) * s

    return dict(
        embed=w((num_clients, embed_dim), 0.1),
        wp_feat=w((n_feat, embed_dim)),
        wp_emb=w((embed_dim, embed_dim)),
        bp=w((1, embed_dim)),
        wv=w((num_layers, embed_dim, embed_dim)),
        bv=w((num_layers, 1, embed_dim)),
        wo=w((num_layers, embed_dim, embed_dim)),
        bo=w((num_layers, 1, embed_dim)),
        ln1g=jnp.ones((num_layers, 1, embed_dim), jnp.float32),
        ln1b=jnp.zeros((num_layers, 1, embed_dim), jnp.float32),
        w1=w((num_layers, embed_dim, ff)),
        b1=w((num_layers, 1, ff)),
        w2=w((num_layers, ff, embed_dim)),
        b2=w((num_layers, 1, embed_dim)),
        ln2g=jnp.ones((num_layers, 1, embed_dim), jnp.float32),
        ln2b=jnp.zeros((num_layers, 1, embed_dim), jnp.float32),
        wa=w((embed_dim, half)),
        ba=w((1, half)),
        wb=w((half, 1)),
        bb=w((1, 1)),
    )


def client_payment_transformer(x, params, *, num_layers, num_clients):
    B, input_dim = x.shape
    n_feat = input_dim - 1
    E = params["embed"].shape[1]
    ff = params["w1"].shape[-1]
    half = params["wa"].shape[-1]

    # Batch tiling: TM rows per grid step (sublane-aligned), grid over tiles.
    TM = min(256, _round_up(B, 8))
    B_pad = _round_up(B, TM)
    num_tiles = B_pad // TM

    # Split x in the wrapper (lane-aligned feats, int32 ids).  Ids are clipped
    # so the HBM gather stays in bounds (PyTorch nn.Embedding would raise on
    # out-of-range ids; documented divergence).
    ids = jnp.clip(x[:, 0].astype(jnp.int32), 0, num_clients - 1)
    feats = x[:, 1:]
    ids = jnp.pad(ids, (0, B_pad - B))
    feats = jnp.pad(feats, ((0, B_pad - B), (0, 0)))

    # ---- wrapper-side weight folding (would be done once at load time) ----
    emb_proj = params["embed"] @ params["wp_emb"]                      # (num_clients, E)
    wvo = jnp.einsum("lij,ljk->lik", params["wv"], params["wo"])       # (L, E, E)
    bvo = jnp.einsum("lij,ljk->lik", params["bv"], params["wo"]) + params["bo"]
    wb_row = params["wb"].T                                            # (1, half)

    weight_arrays = [
        params["wp_feat"], params["bp"],
        wvo, bvo,
        params["ln1g"], params["ln1b"],
        params["w1"], params["b1"], params["w2"], params["b2"],
        params["ln2g"], params["ln2b"],
        params["wa"], params["ba"], wb_row, params["bb"],
    ]

    def full_spec(a):
        # Full-shape block, constant index map -> stays VMEM-resident across tiles.
        return pl.BlockSpec(a.shape, lambda i, *_: (0,) * a.ndim)

    in_specs = (
        [pl.BlockSpec((TM, n_feat), lambda i, *_: (i, 0)),   # feats, tiled over batch
         pl.BlockSpec(memory_space=pl.ANY)]                  # emb_proj stays in HBM
        + [full_spec(a) for a in weight_arrays]
    )

    flops = 2 * B_pad * (n_feat * E + num_layers * (E * E + 2 * E * ff)
                         + E * half + half)
    bytes_weights = sum(int(a.size) * a.dtype.itemsize for a in weight_arrays)
    bytes_accessed = (int(feats.size) * 4 + int(ids.size) * 4
                      + B_pad * E * 4          # gathered embedding rows
                      + bytes_weights + B_pad * 4)

    kernel = functools.partial(client_payment_kernel, num_layers=num_layers, tm=TM)

    out = pl.pallas_call(
        kernel,
        out_shape=jax.ShapeDtypeStruct((B_pad, 1), jnp.float32),
        grid_spec=pltpu.PrefetchScalarGridSpec(
            num_scalar_prefetch=1,            # client ids -> SMEM
            grid=(num_tiles,),
            in_specs=in_specs,
            out_specs=pl.BlockSpec((TM, 1), lambda i, *_: (i, 0)),
            scratch_shapes=[pltpu.VMEM((TM, E), jnp.float32),
                            pltpu.SemaphoreType.DMA((1,))],
        ),
        compiler_params=pltpu.CompilerParams(
            dimension_semantics=("parallel",),
            vmem_limit_bytes=32 * 1024 * 1024,
        ),
        cost_estimate=pl.CostEstimate(
            flops=flops,
            transcendentals=4 * num_layers * B_pad,
            bytes_accessed=bytes_accessed,
        ),
    )(ids, feats, emb_proj, *weight_arrays)

    return out[:B, 0]


def reference(x, params, *, num_layers, num_clients):
    """Pure-JAX reference of the same forward pass (unfused weights)."""
    ids = jnp.clip(x[:, 0].astype(jnp.int32), 0, num_clients - 1)
    feats = x[:, 1:]
    emb = params["embed"][ids]
    h = feats @ params["wp_feat"] + emb @ params["wp_emb"] + params["bp"]
    for l in range(num_layers):
        v = h @ params["wv"][l] + params["bv"][l]
        attn = v @ params["wo"][l] + params["bo"][l]
        h = _layernorm(h + attn, params["ln1g"][l], params["ln1b"][l])
        f = jnp.maximum(h @ params["w1"][l] + params["b1"][l], 0.0)
        f = f @ params["w2"][l] + params["b2"][l]
        h = _layernorm(h + f, params["ln2g"][l], params["ln2b"][l])
    o = jnp.maximum(h @ params["wa"] + params["ba"], 0.0)
    o = o @ params["wb"] + params["bb"]
    return o[:, 0]


if __name__ == "__main__":
    # Small shapes consistent with the module's forward.
    B = 8             # batch
    INPUT_DIM = 9     # column 0 = client id, 8 real-valued features
    EMBED_DIM = 32
    NUM_LAYERS = 2
    NUM_CLIENTS = 64

    key = jax.random.PRNGKey(0)
    k_ids, k_feat, k_par = jax.random.split(key, 3)

    client_ids = jax.random.randint(k_ids, (B, 1), 0, NUM_CLIENTS).astype(jnp.float32)
    feats = jax.random.normal(k_feat, (B, INPUT_DIM - 1), jnp.float32)
    x = jnp.concatenate([client_ids, feats], axis=1)       # (B, INPUT_DIM)

    params = init_params(k_par, input_dim=INPUT_DIM, embed_dim=EMBED_DIM,
                         num_layers=NUM_LAYERS, num_clients=NUM_CLIENTS)

    out = client_payment_transformer(x, params,
                                     num_layers=NUM_LAYERS, num_clients=NUM_CLIENTS)
    out = jax.block_until_ready(out)

    ref = jax.block_until_ready(
        reference(x, params, num_layers=NUM_LAYERS, num_clients=NUM_CLIENTS))
    assert out.shape == (B,)
    assert jnp.allclose(out, ref, atol=1e-4, rtol=1e-4), (out, ref)

    print("KERNEL_OK")
</pallas_src>

<mosaic_0001>
module attributes {stable_mosaic.version = 11 : i64} {
  func.func @client_payment_kernel(%arg0: i32, %arg1: memref<8xi32, #tpu.memory_space<smem>>, %arg2: memref<8x8xf32, #tpu.memory_space<vmem>>, %arg3: memref<64x32xf32, #tpu.memory_space<any>>, %arg4: memref<8x32xf32, #tpu.memory_space<vmem>>, %arg5: memref<1x32xf32, #tpu.memory_space<vmem>>, %arg6: memref<2x32x32xf32, #tpu.memory_space<vmem>>, %arg7: memref<2x1x32xf32, #tpu.memory_space<vmem>>, %arg8: memref<2x1x32xf32, #tpu.memory_space<vmem>>, %arg9: memref<2x1x32xf32, #tpu.memory_space<vmem>>, %arg10: memref<2x32x128xf32, #tpu.memory_space<vmem>>, %arg11: memref<2x1x128xf32, #tpu.memory_space<vmem>>, %arg12: memref<2x128x32xf32, #tpu.memory_space<vmem>>, %arg13: memref<2x1x32xf32, #tpu.memory_space<vmem>>, %arg14: memref<2x1x32xf32, #tpu.memory_space<vmem>>, %arg15: memref<2x1x32xf32, #tpu.memory_space<vmem>>, %arg16: memref<32x16xf32, #tpu.memory_space<vmem>>, %arg17: memref<1x16xf32, #tpu.memory_space<vmem>>, %arg18: memref<1x16xf32, #tpu.memory_space<vmem>>, %arg19: memref<1x1xf32, #tpu.memory_space<vmem>>, %arg20: memref<8x1xf32, #tpu.memory_space<vmem>>, %arg21: memref<8x32xf32, #tpu.memory_space<vmem>>, %arg22: memref<1x!tpu.dma_semaphore, #tpu.memory_space<semaphore_mem>>) attributes {dimension_semantics = [#tpu.dimension_semantics<parallel>], iteration_bounds = array<i64: 1>, scalar_prefetch = 1 : i64, scratch_operands = 2 : i64, tpu.core_type = #tpu.core_type<tc>, window_params = [{transform_indices = @transform_0, window_bounds = array<i64: 8, 8>}, {}, {pipeline_mode = #tpu.pipeline_mode<synchronous>, transform_indices = @transform_2, window_bounds = array<i64: 8, 32>}, {pipeline_mode = #tpu.pipeline_mode<synchronous>, transform_indices = @transform_3, window_bounds = array<i64: 1, 32>}, {pipeline_mode = #tpu.pipeline_mode<synchronous>, transform_indices = @transform_4, window_bounds = array<i64: 2, 32, 32>}, {pipeline_mode = #tpu.pipeline_mode<synchronous>, transform_indices = @transform_5, window_bounds = array<i64: 2, 1, 32>}, {pipeline_mode = #tpu.pipeline_mode<synchronous>, transform_indices = @transform_6, window_bounds = array<i64: 2, 1, 32>}, {pipeline_mode = #tpu.pipeline_mode<synchronous>, transform_indices = @transform_7, window_bounds = array<i64: 2, 1, 32>}, {pipeline_mode = #tpu.pipeline_mode<synchronous>, transform_indices = @transform_8, window_bounds = array<i64: 2, 32, 128>}, {pipeline_mode = #tpu.pipeline_mode<synchronous>, transform_indices = @transform_9, window_bounds = array<i64: 2, 1, 128>}, {pipeline_mode = #tpu.pipeline_mode<synchronous>, transform_indices = @transform_10, window_bounds = array<i64: 2, 128, 32>}, {pipeline_mode = #tpu.pipeline_mode<synchronous>, transform_indices = @transform_11, window_bounds = array<i64: 2, 1, 32>}, {pipeline_mode = #tpu.pipeline_mode<synchronous>, transform_indices = @transform_12, window_bounds = array<i64: 2, 1, 32>}, {pipeline_mode = #tpu.pipeline_mode<synchronous>, transform_indices = @transform_13, window_bounds = array<i64: 2, 1, 32>}, {pipeline_mode = #tpu.pipeline_mode<synchronous>, transform_indices = @transform_14, window_bounds = array<i64: 32, 16>}, {pipeline_mode = #tpu.pipeline_mode<synchronous>, transform_indices = @transform_15, window_bounds = array<i64: 1, 16>}, {pipeline_mode = #tpu.pipeline_mode<synchronous>, transform_indices = @transform_16, window_bounds = array<i64: 1, 16>}, {pipeline_mode = #tpu.pipeline_mode<synchronous>, transform_indices = @transform_17, window_bounds = array<i64: 1, 1>}, {transform_indices = @transform_18, window_bounds = array<i64: 8, 1>}]} {
    %c8_i32 = arith.constant 8 : i32
    %0 = arith.muli %arg0, %c8_i32 : i32
    %c0_i32 = arith.constant 0 : i32
    %c8_i32_0 = arith.constant 8 : i32
    %1 = arith.addi %c0_i32, %c8_i32_0 : i32
    %c1_i32 = arith.constant 1 : i32
    scf.for %arg23 = %c0_i32 to %1 step %c1_i32  : i32 {
      %c1_i32_113 = arith.constant 1 : i32
      %181 = arith.muli %arg23, %c1_i32_113 : i32
      %c0_i32_114 = arith.constant 0 : i32
      %182 = arith.addi %c0_i32_114, %181 : i32
      %183 = arith.addi %0, %182 : i32
      %184 = arith.index_cast %183 : i32 to index
      %185 = memref.load %arg1[%184] : memref<8xi32, #tpu.memory_space<smem>>
      %c0_i32_115 = arith.constant 0 : i32
      %c0_i32_116 = arith.constant 0 : i32
      %186 = tpu.memref_slice %arg3[%185, %c0_i32_116] : memref<64x32xf32, #tpu.memory_space<any>> -> memref<1x32xf32, #tpu.memory_space<any>>
      %c0_i32_117 = arith.constant 0 : i32
      %187 = tpu.memref_slice %arg21[%182, %c0_i32_117] : memref<8x32xf32, #tpu.memory_space<vmem>> -> memref<1x32xf32, #tpu.memory_space<vmem>>
      %188 = tpu.memref_slice %arg22[%c0_i32_115] : memref<1x!tpu.dma_semaphore, #tpu.memory_space<semaphore_mem>> -> memref<1x!tpu.dma_semaphore, #tpu.memory_space<semaphore_mem>>
      %189 = tpu.memref_squeeze %188 : memref<1x!tpu.dma_semaphore, #tpu.memory_space<semaphore_mem>> -> memref<!tpu.dma_semaphore, #tpu.memory_space<semaphore_mem>>
      tpu.enqueue_dma source(%186 : memref<1x32xf32, #tpu.memory_space<any>>) target(%187 : memref<1x32xf32, #tpu.memory_space<vmem>>) target_semaphore(%189 : memref<!tpu.dma_semaphore, #tpu.memory_space<semaphore_mem>>)
    }
    %c8_i32_1 = arith.constant 8 : i32
    %c0 = arith.constant 0 : index
    %c0_2 = arith.constant 0 : index
    %2 = vector.load %arg2[%c0, %c0_2] : memref<8x8xf32, #tpu.memory_space<vmem>>, vector<8x8xf32>
    %c0_3 = arith.constant 0 : index
    %c0_4 = arith.constant 0 : index
    %3 = vector.load %arg4[%c0_3, %c0_4] : memref<8x32xf32, #tpu.memory_space<vmem>>, vector<8x32xf32>
    %cst = arith.constant dense<0.000000e+00> : vector<8x32xf32>
    %4 = tpu.matmul %2, %3, %cst {dimension_numbers = #tpu.dot_dimension_numbers<[1], [0], [0], [1], [0, 0, 1, 1], [], []>} : vector<8x8xf32>, vector<8x32xf32>, vector<8x32xf32> -> vector<8x32xf32>
    %c0_5 = arith.constant 0 : index
    %c0_6 = arith.constant 0 : index
    %5 = vector.load %arg5[%c0_5, %c0_6] : memref<1x32xf32, #tpu.memory_space<vmem>>, vector<1x32xf32>
    %6 = vector.broadcast %5 : vector<1x32xf32> to vector<8x32xf32>
    %7 = arith.addf %4, %6 : vector<8x32xf32>
    %c0_i32_7 = arith.constant 0 : i32
    %c8_i32_8 = arith.constant 8 : i32
    %8 = arith.addi %c0_i32_7, %c8_i32_8 : i32
    %c1_i32_9 = arith.constant 1 : i32
    scf.for %arg23 = %c0_i32_7 to %8 step %c1_i32_9  : i32 {
      %c1_i32_113 = arith.constant 1 : i32
      %181 = arith.muli %arg23, %c1_i32_113 : i32
      %c0_i32_114 = arith.constant 0 : i32
      %182 = arith.addi %c0_i32_114, %181 : i32
      %c0_i32_115 = arith.constant 0 : i32
      %c0_i32_116 = arith.constant 0 : i32
      %c0_i32_117 = arith.constant 0 : i32
      %183 = tpu.memref_slice %arg3[%c0_i32_116, %c0_i32_117] : memref<64x32xf32, #tpu.memory_space<any>> -> memref<1x32xf32, #tpu.memory_space<any>>
      %c0_i32_118 = arith.constant 0 : i32
      %184 = tpu.memref_slice %arg21[%182, %c0_i32_118] : memref<8x32xf32, #tpu.memory_space<vmem>> -> memref<1x32xf32, #tpu.memory_space<vmem>>
      %185 = tpu.memref_slice %arg22[%c0_i32_115] : memref<1x!tpu.dma_semaphore, #tpu.memory_space<semaphore_mem>> -> memref<1x!tpu.dma_semaphore, #tpu.memory_space<semaphore_mem>>
      %186 = tpu.memref_squeeze %185 : memref<1x!tpu.dma_semaphore, #tpu.memory_space<semaphore_mem>> -> memref<!tpu.dma_semaphore, #tpu.memory_space<semaphore_mem>>
      tpu.wait_dma2 semaphore(%186 : memref<!tpu.dma_semaphore, #tpu.memory_space<semaphore_mem>>) src(%183 : memref<1x32xf32, #tpu.memory_space<any>>) dst(%184 : memref<1x32xf32, #tpu.memory_space<vmem>>)
    }
    %c8_i32_10 = arith.constant 8 : i32
    %c0_11 = arith.constant 0 : index
    %c0_12 = arith.constant 0 : index
    %9 = vector.load %arg21[%c0_11, %c0_12] : memref<8x32xf32, #tpu.memory_space<vmem>>, vector<8x32xf32>
    %10 = arith.addf %7, %9 : vector<8x32xf32>
    %c0_13 = arith.constant 0 : index
    %c0_14 = arith.constant 0 : index
    %c0_15 = arith.constant 0 : index
    %11 = vector.load %arg6[%c0_13, %c0_14, %c0_15] : memref<2x32x32xf32, #tpu.memory_space<vmem>>, vector<1x32x32xf32>
    %12 = vector.shape_cast %11 : vector<1x32x32xf32> to vector<32x32xf32>
    %cst_16 = arith.constant dense<0.000000e+00> : vector<8x32xf32>
    %13 = tpu.matmul %10, %12, %cst_16 {dimension_numbers = #tpu.dot_dimension_numbers<[1], [0], [0], [1], [0, 0, 1, 1], [], []>} : vector<8x32xf32>, vector<32x32xf32>, vector<8x32xf32> -> vector<8x32xf32>
    %c0_17 = arith.constant 0 : index
    %c0_18 = arith.constant 0 : index
    %c0_19 = arith.constant 0 : index
    %14 = vector.load %arg7[%c0_17, %c0_18, %c0_19] : memref<2x1x32xf32, #tpu.memory_space<vmem>>, vector<1x1x32xf32>
    %15 = vector.shape_cast %14 : vector<1x1x32xf32> to vector<1x32xf32>
    %16 = vector.broadcast %15 : vector<1x32xf32> to vector<8x32xf32>
    %17 = arith.addf %13, %16 : vector<8x32xf32>
    %18 = arith.addf %10, %17 : vector<8x32xf32>
    %c0_20 = arith.constant 0 : index
    %c0_21 = arith.constant 0 : index
    %c0_22 = arith.constant 0 : index
    %19 = vector.load %arg8[%c0_20, %c0_21, %c0_22] : memref<2x1x32xf32, #tpu.memory_space<vmem>>, vector<1x1x32xf32>
    %20 = vector.shape_cast %19 : vector<1x1x32xf32> to vector<1x32xf32>
    %c0_23 = arith.constant 0 : index
    %c0_24 = arith.constant 0 : index
    %c0_25 = arith.constant 0 : index
    %21 = vector.load %arg9[%c0_23, %c0_24, %c0_25] : memref<2x1x32xf32, #tpu.memory_space<vmem>>, vector<1x1x32xf32>
    %22 = vector.shape_cast %21 : vector<1x1x32xf32> to vector<1x32xf32>
    %cst_26 = arith.constant dense<0.000000e+00> : vector<8xf32>
    %23 = vector.multi_reduction <add>, %18, %cst_26 [1] : vector<8x32xf32> to vector<8xf32>
    %24 = vector.shape_cast %23 : vector<8xf32> to vector<8x1xf32>
    %cst_27 = arith.constant 3.200000e+01 : f32
    %25 = vector.broadcast %cst_27 : f32 to vector<8x1xf32>
    %26 = arith.divf %24, %25 : vector<8x1xf32>
    %27 = arith.mulf %18, %18 : vector<8x32xf32>
    %cst_28 = arith.constant dense<0.000000e+00> : vector<8xf32>
    %28 = vector.multi_reduction <add>, %27, %cst_28 [1] : vector<8x32xf32> to vector<8xf32>
    %29 = vector.shape_cast %28 : vector<8xf32> to vector<8x1xf32>
    %cst_29 = arith.constant 3.200000e+01 : f32
    %30 = vector.broadcast %cst_29 : f32 to vector<8x1xf32>
    %31 = arith.divf %29, %30 : vector<8x1xf32>
    %32 = arith.mulf %26, %26 : vector<8x1xf32>
    %33 = arith.subf %31, %32 : vector<8x1xf32>
    %34 = vector.broadcast %26 : vector<8x1xf32> to vector<8x32xf32>
    %35 = arith.subf %18, %34 : vector<8x32xf32>
    %cst_30 = arith.constant 9.99999974E-6 : f32
    %36 = vector.broadcast %cst_30 : f32 to vector<8x1xf32>
    %37 = arith.addf %33, %36 : vector<8x1xf32>
    %38 = math.rsqrt %37 : vector<8x1xf32>
    %39 = vector.broadcast %38 : vector<8x1xf32> to vector<8x32xf32>
    %40 = arith.mulf %35, %39 : vector<8x32xf32>
    %41 = vector.broadcast %20 : vector<1x32xf32> to vector<8x32xf32>
    %42 = arith.mulf %40, %41 : vector<8x32xf32>
    %43 = vector.broadcast %22 : vector<1x32xf32> to vector<8x32xf32>
    %44 = arith.addf %42, %43 : vector<8x32xf32>
    %c0_31 = arith.constant 0 : index
    %c0_32 = arith.constant 0 : index
    %c0_33 = arith.constant 0 : index
    %45 = vector.load %arg10[%c0_31, %c0_32, %c0_33] : memref<2x32x128xf32, #tpu.memory_space<vmem>>, vector<1x32x128xf32>
    %46 = vector.shape_cast %45 : vector<1x32x128xf32> to vector<32x128xf32>
    %cst_34 = arith.constant dense<0.000000e+00> : vector<8x128xf32>
    %47 = tpu.matmul %44, %46, %cst_34 {dimension_numbers = #tpu.dot_dimension_numbers<[1], [0], [0], [1], [0, 0, 1, 1], [], []>} : vector<8x32xf32>, vector<32x128xf32>, vector<8x128xf32> -> vector<8x128xf32>
    %c0_35 = arith.constant 0 : index
    %c0_36 = arith.constant 0 : index
    %c0_37 = arith.constant 0 : index
    %48 = vector.load %arg11[%c0_35, %c0_36, %c0_37] : memref<2x1x128xf32, #tpu.memory_space<vmem>>, vector<1x1x128xf32>
    %49 = vector.shape_cast %48 : vector<1x1x128xf32> to vector<1x128xf32>
    %50 = vector.broadcast %49 : vector<1x128xf32> to vector<8x128xf32>
    %51 = arith.addf %47, %50 : vector<8x128xf32>
    %cst_38 = arith.constant 0.000000e+00 : f32
    %52 = vector.broadcast %cst_38 : f32 to vector<8x128xf32>
    %53 = arith.maximumf %51, %52 : vector<8x128xf32>
    %c0_39 = arith.constant 0 : index
    %c0_40 = arith.constant 0 : index
    %c0_41 = arith.constant 0 : index
    %54 = vector.load %arg12[%c0_39, %c0_40, %c0_41] : memref<2x128x32xf32, #tpu.memory_space<vmem>>, vector<1x128x32xf32>
    %55 = vector.shape_cast %54 : vector<1x128x32xf32> to vector<128x32xf32>
    %cst_42 = arith.constant dense<0.000000e+00> : vector<8x32xf32>
    %56 = tpu.matmul %53, %55, %cst_42 {dimension_numbers = #tpu.dot_dimension_numbers<[1], [0], [0], [1], [0, 0, 1, 1], [], []>} : vector<8x128xf32>, vector<128x32xf32>, vector<8x32xf32> -> vector<8x32xf32>
    %c0_43 = arith.constant 0 : index
    %c0_44 = arith.constant 0 : index
    %c0_45 = arith.constant 0 : index
    %57 = vector.load %arg13[%c0_43, %c0_44, %c0_45] : memref<2x1x32xf32, #tpu.memory_space<vmem>>, vector<1x1x32xf32>
    %58 = vector.shape_cast %57 : vector<1x1x32xf32> to vector<1x32xf32>
    %59 = vector.broadcast %58 : vector<1x32xf32> to vector<8x32xf32>
    %60 = arith.addf %56, %59 : vector<8x32xf32>
    %61 = arith.addf %44, %60 : vector<8x32xf32>
    %c0_46 = arith.constant 0 : index
    %c0_47 = arith.constant 0 : index
    %c0_48 = arith.constant 0 : index
    %62 = vector.load %arg14[%c0_46, %c0_47, %c0_48] : memref<2x1x32xf32, #tpu.memory_space<vmem>>, vector<1x1x32xf32>
    %63 = vector.shape_cast %62 : vector<1x1x32xf32> to vector<1x32xf32>
    %c0_49 = arith.constant 0 : index
    %c0_50 = arith.constant 0 : index
    %c0_51 = arith.constant 0 : index
    %64 = vector.load %arg15[%c0_49, %c0_50, %c0_51] : memref<2x1x32xf32, #tpu.memory_space<vmem>>, vector<1x1x32xf32>
    %65 = vector.shape_cast %64 : vector<1x1x32xf32> to vector<1x32xf32>
    %cst_52 = arith.constant dense<0.000000e+00> : vector<8xf32>
    %66 = vector.multi_reduction <add>, %61, %cst_52 [1] : vector<8x32xf32> to vector<8xf32>
    %67 = vector.shape_cast %66 : vector<8xf32> to vector<8x1xf32>
    %cst_53 = arith.constant 3.200000e+01 : f32
    %68 = vector.broadcast %cst_53 : f32 to vector<8x1xf32>
    %69 = arith.divf %67, %68 : vector<8x1xf32>
    %70 = arith.mulf %61, %61 : vector<8x32xf32>
    %cst_54 = arith.constant dense<0.000000e+00> : vector<8xf32>
    %71 = vector.multi_reduction <add>, %70, %cst_54 [1] : vector<8x32xf32> to vector<8xf32>
    %72 = vector.shape_cast %71 : vector<8xf32> to vector<8x1xf32>
    %cst_55 = arith.constant 3.200000e+01 : f32
    %73 = vector.broadcast %cst_55 : f32 to vector<8x1xf32>
    %74 = arith.divf %72, %73 : vector<8x1xf32>
    %75 = arith.mulf %69, %69 : vector<8x1xf32>
    %76 = arith.subf %74, %75 : vector<8x1xf32>
    %77 = vector.broadcast %69 : vector<8x1xf32> to vector<8x32xf32>
    %78 = arith.subf %61, %77 : vector<8x32xf32>
    %cst_56 = arith.constant 9.99999974E-6 : f32
    %79 = vector.broadcast %cst_56 : f32 to vector<8x1xf32>
    %80 = arith.addf %76, %79 : vector<8x1xf32>
    %81 = math.rsqrt %80 : vector<8x1xf32>
    %82 = vector.broadcast %81 : vector<8x1xf32> to vector<8x32xf32>
    %83 = arith.mulf %78, %82 : vector<8x32xf32>
    %84 = vector.broadcast %63 : vector<1x32xf32> to vector<8x32xf32>
    %85 = arith.mulf %83, %84 : vector<8x32xf32>
    %86 = vector.broadcast %65 : vector<1x32xf32> to vector<8x32xf32>
    %87 = arith.addf %85, %86 : vector<8x32xf32>
    %c1 = arith.constant 1 : index
    %c0_57 = arith.constant 0 : index
    %c0_58 = arith.constant 0 : index
    %88 = vector.load %arg6[%c1, %c0_57, %c0_58] : memref<2x32x32xf32, #tpu.memory_space<vmem>>, vector<1x32x32xf32>
    %89 = vector.shape_cast %88 : vector<1x32x32xf32> to vector<32x32xf32>
    %cst_59 = arith.constant dense<0.000000e+00> : vector<8x32xf32>
    %90 = tpu.matmul %87, %89, %cst_59 {dimension_numbers = #tpu.dot_dimension_numbers<[1], [0], [0], [1], [0, 0, 1, 1], [], []>} : vector<8x32xf32>, vector<32x32xf32>, vector<8x32xf32> -> vector<8x32xf32>
    %c1_60 = arith.constant 1 : index
    %c0_61 = arith.constant 0 : index
    %c0_62 = arith.constant 0 : index
    %91 = vector.load %arg7[%c1_60, %c0_61, %c0_62] : memref<2x1x32xf32, #tpu.memory_space<vmem>>, vector<1x1x32xf32>
    %92 = vector.shape_cast %91 : vector<1x1x32xf32> to vector<1x32xf32>
    %93 = vector.broadcast %92 : vector<1x32xf32> to vector<8x32xf32>
    %94 = arith.addf %90, %93 : vector<8x32xf32>
    %95 = arith.addf %87, %94 : vector<8x32xf32>
    %c1_63 = arith.constant 1 : index
    %c0_64 = arith.constant 0 : index
    %c0_65 = arith.constant 0 : index
    %96 = vector.load %arg8[%c1_63, %c0_64, %c0_65] : memref<2x1x32xf32, #tpu.memory_space<vmem>>, vector<1x1x32xf32>
    %97 = vector.shape_cast %96 : vector<1x1x32xf32> to vector<1x32xf32>
    %c1_66 = arith.constant 1 : index
    %c0_67 = arith.constant 0 : index
    %c0_68 = arith.constant 0 : index
    %98 = vector.load %arg9[%c1_66, %c0_67, %c0_68] : memref<2x1x32xf32, #tpu.memory_space<vmem>>, vector<1x1x32xf32>
    %99 = vector.shape_cast %98 : vector<1x1x32xf32> to vector<1x32xf32>
    %cst_69 = arith.constant dense<0.000000e+00> : vector<8xf32>
    %100 = vector.multi_reduction <add>, %95, %cst_69 [1] : vector<8x32xf32> to vector<8xf32>
    %101 = vector.shape_cast %100 : vector<8xf32> to vector<8x1xf32>
    %cst_70 = arith.constant 3.200000e+01 : f32
    %102 = vector.broadcast %cst_70 : f32 to vector<8x1xf32>
    %103 = arith.divf %101, %102 : vector<8x1xf32>
    %104 = arith.mulf %95, %95 : vector<8x32xf32>
    %cst_71 = arith.constant dense<0.000000e+00> : vector<8xf32>
    %105 = vector.multi_reduction <add>, %104, %cst_71 [1] : vector<8x32xf32> to vector<8xf32>
    %106 = vector.shape_cast %105 : vector<8xf32> to vector<8x1xf32>
    %cst_72 = arith.constant 3.200000e+01 : f32
    %107 = vector.broadcast %cst_72 : f32 to vector<8x1xf32>
    %108 = arith.divf %106, %107 : vector<8x1xf32>
    %109 = arith.mulf %103, %103 : vector<8x1xf32>
    %110 = arith.subf %108, %109 : vector<8x1xf32>
    %111 = vector.broadcast %103 : vector<8x1xf32> to vector<8x32xf32>
    %112 = arith.subf %95, %111 : vector<8x32xf32>
    %cst_73 = arith.constant 9.99999974E-6 : f32
    %113 = vector.broadcast %cst_73 : f32 to vector<8x1xf32>
    %114 = arith.addf %110, %113 : vector<8x1xf32>
    %115 = math.rsqrt %114 : vector<8x1xf32>
    %116 = vector.broadcast %115 : vector<8x1xf32> to vector<8x32xf32>
    %117 = arith.mulf %112, %116 : vector<8x32xf32>
    %118 = vector.broadcast %97 : vector<1x32xf32> to vector<8x32xf32>
    %119 = arith.mulf %117, %118 : vector<8x32xf32>
    %120 = vector.broadcast %99 : vector<1x32xf32> to vector<8x32xf32>
    %121 = arith.addf %119, %120 : vector<8x32xf32>
    %c1_74 = arith.constant 1 : index
    %c0_75 = arith.constant 0 : index
    %c0_76 = arith.constant 0 : index
    %122 = vector.load %arg10[%c1_74, %c0_75, %c0_76] : memref<2x32x128xf32, #tpu.memory_space<vmem>>, vector<1x32x128xf32>
    %123 = vector.shape_cast %122 : vector<1x32x128xf32> to vector<32x128xf32>
    %cst_77 = arith.constant dense<0.000000e+00> : vector<8x128xf32>
    %124 = tpu.matmul %121, %123, %cst_77 {dimension_numbers = #tpu.dot_dimension_numbers<[1], [0], [0], [1], [0, 0, 1, 1], [], []>} : vector<8x32xf32>, vector<32x128xf32>, vector<8x128xf32> -> vector<8x128xf32>
    %c1_78 = arith.constant 1 : index
    %c0_79 = arith.constant 0 : index
    %c0_80 = arith.constant 0 : index
    %125 = vector.load %arg11[%c1_78, %c0_79, %c0_80] : memref<2x1x128xf32, #tpu.memory_space<vmem>>, vector<1x1x128xf32>
    %126 = vector.shape_cast %125 : vector<1x1x128xf32> to vector<1x128xf32>
    %127 = vector.broadcast %126 : vector<1x128xf32> to vector<8x128xf32>
    %128 = arith.addf %124, %127 : vector<8x128xf32>
    %cst_81 = arith.constant 0.000000e+00 : f32
    %129 = vector.broadcast %cst_81 : f32 to vector<8x128xf32>
    %130 = arith.maximumf %128, %129 : vector<8x128xf32>
    %c1_82 = arith.constant 1 : index
    %c0_83 = arith.constant 0 : index
    %c0_84 = arith.constant 0 : index
    %131 = vector.load %arg12[%c1_82, %c0_83, %c0_84] : memref<2x128x32xf32, #tpu.memory_space<vmem>>, vector<1x128x32xf32>
    %132 = vector.shape_cast %131 : vector<1x128x32xf32> to vector<128x32xf32>
    %cst_85 = arith.constant dense<0.000000e+00> : vector<8x32xf32>
    %133 = tpu.matmul %130, %132, %cst_85 {dimension_numbers = #tpu.dot_dimension_numbers<[1], [0], [0], [1], [0, 0, 1, 1], [], []>} : vector<8x128xf32>, vector<128x32xf32>, vector<8x32xf32> -> vector<8x32xf32>
    %c1_86 = arith.constant 1 : index
    %c0_87 = arith.constant 0 : index
    %c0_88 = arith.constant 0 : index
    %134 = vector.load %arg13[%c1_86, %c0_87, %c0_88] : memref<2x1x32xf32, #tpu.memory_space<vmem>>, vector<1x1x32xf32>
    %135 = vector.shape_cast %134 : vector<1x1x32xf32> to vector<1x32xf32>
    %136 = vector.broadcast %135 : vector<1x32xf32> to vector<8x32xf32>
    %137 = arith.addf %133, %136 : vector<8x32xf32>
    %138 = arith.addf %121, %137 : vector<8x32xf32>
    %c1_89 = arith.constant 1 : index
    %c0_90 = arith.constant 0 : index
    %c0_91 = arith.constant 0 : index
    %139 = vector.load %arg14[%c1_89, %c0_90, %c0_91] : memref<2x1x32xf32, #tpu.memory_space<vmem>>, vector<1x1x32xf32>
    %140 = vector.shape_cast %139 : vector<1x1x32xf32> to vector<1x32xf32>
    %c1_92 = arith.constant 1 : index
    %c0_93 = arith.constant 0 : index
    %c0_94 = arith.constant 0 : index
    %141 = vector.load %arg15[%c1_92, %c0_93, %c0_94] : memref<2x1x32xf32, #tpu.memory_space<vmem>>, vector<1x1x32xf32>
    %142 = vector.shape_cast %141 : vector<1x1x32xf32> to vector<1x32xf32>
    %cst_95 = arith.constant dense<0.000000e+00> : vector<8xf32>
    %143 = vector.multi_reduction <add>, %138, %cst_95 [1] : vector<8x32xf32> to vector<8xf32>
    %144 = vector.shape_cast %143 : vector<8xf32> to vector<8x1xf32>
    %cst_96 = arith.constant 3.200000e+01 : f32
    %145 = vector.broadcast %cst_96 : f32 to vector<8x1xf32>
    %146 = arith.divf %144, %145 : vector<8x1xf32>
    %147 = arith.mulf %138, %138 : vector<8x32xf32>
    %cst_97 = arith.constant dense<0.000000e+00> : vector<8xf32>
    %148 = vector.multi_reduction <add>, %147, %cst_97 [1] : vector<8x32xf32> to vector<8xf32>
    %149 = vector.shape_cast %148 : vector<8xf32> to vector<8x1xf32>
    %cst_98 = arith.constant 3.200000e+01 : f32
    %150 = vector.broadcast %cst_98 : f32 to vector<8x1xf32>
    %151 = arith.divf %149, %150 : vector<8x1xf32>
    %152 = arith.mulf %146, %146 : vector<8x1xf32>
    %153 = arith.subf %151, %152 : vector<8x1xf32>
    %154 = vector.broadcast %146 : vector<8x1xf32> to vector<8x32xf32>
    %155 = arith.subf %138, %154 : vector<8x32xf32>
    %cst_99 = arith.constant 9.99999974E-6 : f32
    %156 = vector.broadcast %cst_99 : f32 to vector<8x1xf32>
    %157 = arith.addf %153, %156 : vector<8x1xf32>
    %158 = math.rsqrt %157 : vector<8x1xf32>
    %159 = vector.broadcast %158 : vector<8x1xf32> to vector<8x32xf32>
    %160 = arith.mulf %155, %159 : vector<8x32xf32>
    %161 = vector.broadcast %140 : vector<1x32xf32> to vector<8x32xf32>
    %162 = arith.mulf %160, %161 : vector<8x32xf32>
    %163 = vector.broadcast %142 : vector<1x32xf32> to vector<8x32xf32>
    %164 = arith.addf %162, %163 : vector<8x32xf32>
    %c0_100 = arith.constant 0 : index
    %c0_101 = arith.constant 0 : index
    %165 = vector.load %arg16[%c0_100, %c0_101] : memref<32x16xf32, #tpu.memory_space<vmem>>, vector<32x16xf32>
    %cst_102 = arith.constant dense<0.000000e+00> : vector<8x16xf32>
    %166 = tpu.matmul %164, %165, %cst_102 {dimension_numbers = #tpu.dot_dimension_numbers<[1], [0], [0], [1], [0, 0, 1, 1], [], []>} : vector<8x32xf32>, vector<32x16xf32>, vector<8x16xf32> -> vector<8x16xf32>
    %c0_103 = arith.constant 0 : index
    %c0_104 = arith.constant 0 : index
    %167 = vector.load %arg17[%c0_103, %c0_104] : memref<1x16xf32, #tpu.memory_space<vmem>>, vector<1x16xf32>
    %168 = vector.broadcast %167 : vector<1x16xf32> to vector<8x16xf32>
    %169 = arith.addf %166, %168 : vector<8x16xf32>
    %cst_105 = arith.constant 0.000000e+00 : f32
    %170 = vector.broadcast %cst_105 : f32 to vector<8x16xf32>
    %171 = arith.maximumf %169, %170 : vector<8x16xf32>
    %c0_106 = arith.constant 0 : index
    %c0_107 = arith.constant 0 : index
    %172 = vector.load %arg18[%c0_106, %c0_107] : memref<1x16xf32, #tpu.memory_space<vmem>>, vector<1x16xf32>
    %173 = vector.broadcast %172 : vector<1x16xf32> to vector<8x16xf32>
    %174 = arith.mulf %171, %173 : vector<8x16xf32>
    %cst_108 = arith.constant dense<0.000000e+00> : vector<8xf32>
    %175 = vector.multi_reduction <add>, %174, %cst_108 [1] : vector<8x16xf32> to vector<8xf32>
    %176 = vector.shape_cast %175 : vector<8xf32> to vector<8x1xf32>
    %c0_109 = arith.constant 0 : index
    %c0_110 = arith.constant 0 : index
    %177 = vector.load %arg19[%c0_109, %c0_110] : memref<1x1xf32, #tpu.memory_space<vmem>>, vector<1x1xf32>
    %178 = vector.broadcast %177 : vector<1x1xf32> to vector<8x1xf32>
    %179 = arith.addf %176, %178 : vector<8x1xf32>
    %c0_111 = arith.constant 0 : index
    %c0_112 = arith.constant 0 : index
    %180 = vector.load %arg20[%c0_111, %c0_112] : memref<8x1xf32, #tpu.memory_space<vmem>>, vector<8x1xf32>
    tpu.vector_store %arg20[%c0_111, %c0_112], %179 {strides = array<i32>} : memref<8x1xf32, #tpu.memory_space<vmem>>, vector<8x1xf32>,
    return
  }
  func.func @transform_0(%arg0: i32, %arg1: memref<8xi32, #tpu.memory_space<smem>>) -> (i32, i32) {
    %c0_i32 = arith.constant 0 : i32
    %c0_i32_0 = arith.constant 0 : i32
    return %arg0, %c0_i32 : i32, i32
  }
  func.func @transform_2(%arg0: i32, %arg1: memref<8xi32, #tpu.memory_space<smem>>) -> (i32, i32) {
    %c0_i32 = arith.constant 0 : i32
    %c0_i32_0 = arith.constant 0 : i32
    %c0_i32_1 = arith.constant 0 : i32
    return %c0_i32, %c0_i32_0 : i32, i32
  }
  func.func @transform_3(%arg0: i32, %arg1: memref<8xi32, #tpu.memory_space<smem>>) -> (i32, i32) {
    %c0_i32 = arith.constant 0 : i32
    %c0_i32_0 = arith.constant 0 : i32
    %c0_i32_1 = arith.constant 0 : i32
    return %c0_i32, %c0_i32_0 : i32, i32
  }
  func.func @transform_4(%arg0: i32, %arg1: memref<8xi32, #tpu.memory_space<smem>>) -> (i32, i32, i32) {
    %c0_i32 = arith.constant 0 : i32
    %c0_i32_0 = arith.constant 0 : i32
    %c0_i32_1 = arith.constant 0 : i32
    %c0_i32_2 = arith.constant 0 : i32
    return %c0_i32, %c0_i32_0, %c0_i32_1 : i32, i32, i32
  }
  func.func @transform_5(%arg0: i32, %arg1: memref<8xi32, #tpu.memory_space<smem>>) -> (i32, i32, i32) {
    %c0_i32 = arith.constant 0 : i32
    %c0_i32_0 = arith.constant 0 : i32
    %c0_i32_1 = arith.constant 0 : i32
    %c0_i32_2 = arith.constant 0 : i32
    return %c0_i32, %c0_i32_0, %c0_i32_1 : i32, i32, i32
  }
  func.func @transform_6(%arg0: i32, %arg1: memref<8xi32, #tpu.memory_space<smem>>) -> (i32, i32, i32) {
    %c0_i32 = arith.constant 0 : i32
    %c0_i32_0 = arith.constant 0 : i32
    %c0_i32_1 = arith.constant 0 : i32
    %c0_i32_2 = arith.constant 0 : i32
    return %c0_i32, %c0_i32_0, %c0_i32_1 : i32, i32, i32
  }
  func.func @transform_7(%arg0: i32, %arg1: memref<8xi32, #tpu.memory_space<smem>>) -> (i32, i32, i32) {
    %c0_i32 = arith.constant 0 : i32
    %c0_i32_0 = arith.constant 0 : i32
    %c0_i32_1 = arith.constant 0 : i32
    %c0_i32_2 = arith.constant 0 : i32
    return %c0_i32, %c0_i32_0, %c0_i32_1 : i32, i32, i32
  }
  func.func @transform_8(%arg0: i32, %arg1: memref<8xi32, #tpu.memory_space<smem>>) -> (i32, i32, i32) {
    %c0_i32 = arith.constant 0 : i32
    %c0_i32_0 = arith.constant 0 : i32
    %c0_i32_1 = arith.constant 0 : i32
    %c0_i32_2 = arith.constant 0 : i32
    return %c0_i32, %c0_i32_0, %c0_i32_1 : i32, i32, i32
  }
  func.func @transform_9(%arg0: i32, %arg1: memref<8xi32, #tpu.memory_space<smem>>) -> (i32, i32, i32) {
    %c0_i32 = arith.constant 0 : i32
    %c0_i32_0 = arith.constant 0 : i32
    %c0_i32_1 = arith.constant 0 : i32
    %c0_i32_2 = arith.constant 0 : i32
    return %c0_i32, %c0_i32_0, %c0_i32_1 : i32, i32, i32
  }
  func.func @transform_10(%arg0: i32, %arg1: memref<8xi32, #tpu.memory_space<smem>>) -> (i32, i32, i32) {
    %c0_i32 = arith.constant 0 : i32
    %c0_i32_0 = arith.constant 0 : i32
    %c0_i32_1 = arith.constant 0 : i32
    %c0_i32_2 = arith.constant 0 : i32
    return %c0_i32, %c0_i32_0, %c0_i32_1 : i32, i32, i32
  }
  func.func @transform_11(%arg0: i32, %arg1: memref<8xi32, #tpu.memory_space<smem>>) -> (i32, i32, i32) {
    %c0_i32 = arith.constant 0 : i32
    %c0_i32_0 = arith.constant 0 : i32
    %c0_i32_1 = arith.constant 0 : i32
    %c0_i32_2 = arith.constant 0 : i32
    return %c0_i32, %c0_i32_0, %c0_i32_1 : i32, i32, i32
  }
  func.func @transform_12(%arg0: i32, %arg1: memref<8xi32, #tpu.memory_space<smem>>) -> (i32, i32, i32) {
    %c0_i32 = arith.constant 0 : i32
    %c0_i32_0 = arith.constant 0 : i32
    %c0_i32_1 = arith.constant 0 : i32
    %c0_i32_2 = arith.constant 0 : i32
    return %c0_i32, %c0_i32_0, %c0_i32_1 : i32, i32, i32
  }
  func.func @transform_13(%arg0: i32, %arg1: memref<8xi32, #tpu.memory_space<smem>>) -> (i32, i32, i32) {
    %c0_i32 = arith.constant 0 : i32
    %c0_i32_0 = arith.constant 0 : i32
    %c0_i32_1 = arith.constant 0 : i32
    %c0_i32_2 = arith.constant 0 : i32
    return %c0_i32, %c0_i32_0, %c0_i32_1 : i32, i32, i32
  }
  func.func @transform_14(%arg0: i32, %arg1: memref<8xi32, #tpu.memory_space<smem>>) -> (i32, i32) {
    %c0_i32 = arith.constant 0 : i32
    %c0_i32_0 = arith.constant 0 : i32
    %c0_i32_1 = arith.constant 0 : i32
    return %c0_i32, %c0_i32_0 : i32, i32
  }
  func.func @transform_15(%arg0: i32, %arg1: memref<8xi32, #tpu.memory_space<smem>>) -> (i32, i32) {
    %c0_i32 = arith.constant 0 : i32
    %c0_i32_0 = arith.constant 0 : i32
    %c0_i32_1 = arith.constant 0 : i32
    return %c0_i32, %c0_i32_0 : i32, i32
  }
  func.func @transform_16(%arg0: i32, %arg1: memref<8xi32, #tpu.memory_space<smem>>) -> (i32, i32) {
    %c0_i32 = arith.constant 0 : i32
    %c0_i32_0 = arith.constant 0 : i32
    %c0_i32_1 = arith.constant 0 : i32
    return %c0_i32, %c0_i32_0 : i32, i32
  }
  func.func @transform_17(%arg0: i32, %arg1: memref<8xi32, #tpu.memory_space<smem>>) -> (i32, i32) {
    %c0_i32 = arith.constant 0 : i32
    %c0_i32_0 = arith.constant 0 : i32
    %c0_i32_1 = arith.constant 0 : i32
    return %c0_i32, %c0_i32_0 : i32, i32
  }
  func.func @transform_18(%arg0: i32, %arg1: memref<8xi32, #tpu.memory_space<smem>>) -> (i32, i32) {
    %c0_i32 = arith.constant 0 : i32
    %c0_i32_0 = arith.constant 0 : i32
    return %arg0, %c0_i32 : i32, i32
  }
}

</mosaic_0001>

<bundles_post_ra>
// kernel: tpu_custom_call.1
= control target key start
LH: loop header
LB: loop body
LE: loop exit
PB: predicated region body
PF: predicated region fallthrough
CT: control target
= control target key end

     0   :  { %s1742_s0 = inlined_call_operand.vmem [shape: s32[8], index: 0, kind: input, shape index: {}]   ;;  %s1743_s1 = inlined_call_operand.vmem [shape: f32[8,8], index: 1, kind: input, shape index: {}]   ;;  %s1744_s2 = inlined_call_operand.vmem [shape: f32[64,32], index: 2, kind: input, shape index: {}]   ;;  %s1745_s3 = inlined_call_operand.vmem [shape: f32[8,32], index: 3, kind: input, shape index: {}]   ;;  %s1746_s4 = inlined_call_operand.vmem [shape: f32[1,32], index: 4, kind: input, shape index: {}]   ;;  %s1747_s5 = inlined_call_operand.vmem [shape: f32[2,32,32], index: 5, kind: input, shape index: {}]   ;;  %s1748_s6 = inlined_call_operand.vmem [shape: f32[2,1,32], index: 6, kind: input, shape index: {}]   ;;  %s1749_s7 = inlined_call_operand.vmem [shape: f32[2,1,32], index: 7, kind: input, shape index: {}]   ;;  %s1750_s8 = inlined_call_operand.vmem [shape: f32[2,1,32], index: 8, kind: input, shape index: {}]   ;;  %s1751_s9 = inlined_call_operand.vmem [shape: f32[2,32,128], index: 9, kind: input, shape index: {}]   ;;  %s1752_s10 = inlined_call_operand.vmem [shape: f32[2,1,128], index: 10, kind: input, shape index: {}]   ;;  %s1753_s11 = inlined_call_operand.vmem [shape: f32[2,128,32], index: 11, kind: input, shape index: {}]   ;;  %s1754_s12 = inlined_call_operand.vmem [shape: f32[2,1,32], index: 12, kind: input, shape index: {}]   ;;  %s1755_s13 = inlined_call_operand.vmem [shape: f32[2,1,32], index: 13, kind: input, shape index: {}]   ;;  %s1756_s14 = inlined_call_operand.vmem [shape: f32[2,1,32], index: 14, kind: input, shape index: {}]   ;;  %s1757_s15 = inlined_call_operand.vmem [shape: f32[32,16], index: 15, kind: input, shape index: {}]   ;;  %s1758_s16 = inlined_call_operand.vmem [shape: f32[1,16], index: 16, kind: input, shape index: {}]   ;;  %s1759_s17 = inlined_call_operand.vmem [shape: f32[1,16], index: 17, kind: input, shape index: {}]   ;;  %s1760_s19 = inlined_call_operand.vmem [shape: f32[8,1], index: 19, kind: output, shape index: {}]   ;;  %s1761_s18 = inlined_call_operand.<no memory space> [shape: f32[1,1], index: 18, kind: input, shape index: {}]  }
   0x1   :  { %1763 = sst [smem:[#allocation10_spill]] %s1742_s0  ;;  %v28_v0 = vstv %s1761_s18 }
   0x2   :  { %1764 = sst [smem:[#allocation11_spill]] %s1743_s1  ;;  %29 = vst [vmem:[#allocation6] sm:$0x1] %v28_v0 }
   0x3   :  { %1765 = sst [smem:[#allocation12_spill]] %s1744_s2 }
   0x4   :  { %1766 = sst [smem:[#allocation13_spill]] %s1745_s3 }
   0x5   :  { %1767 = sst [smem:[#allocation14_spill]] %s1755_s13 }
   0x6   :  { %s1768_s20 = sld [smem:[#allocation10_spill]] }
   0xc   :  { %s24_s13 = sshll.u32 %s1768_s20, 4  ;;  %s25_s13 = int_to_ptr.vmem [resolvable:$true] %s24_s13 }
   0xd   :  { %s1294_s22 = scalar_lea.vmem %s25_s13, 16  ;;  %p1299_p1 = scmp.lt.s32.totalorder %s25_s13, %s25_s13 }
   0xe   :  { %p1295_p0 = scmp.ne.s32.totalorder %s25_s13, %s1294_s22  ;;  %p1300_p2 = scmp.lt.s32.totalorder %s1294_s22, %s1294_s22 }
  0x10   :  { %p1301_p3 = por %p1300_p2, %p1299_p1 }
  0x12   :  { %p1302_p4 = pnand %p1301_p3, %p1295_p0 }
  0x14   :  { %1305 = shalt.err (!%p1302_p4)  }
  0x15   :  { %s1326_s2 = smov [#allocation5]  }
  0x16   :  { %27 = dma.vmem_to_smem %s25_s13, 16, %s1326_s2, [#allocation4] }
  0x17   :  { %1314 = dma.done.wait [#allocation4], 16 }
  0x18   :  { %1315 = vsyncadd [#allocation4], 4294967280 }
  0x19   :  { %31 = sfence }
  0x1a   :  { %s1318_s23 = smov 0  }
  0x1b LB: > { %s74_s24 = sld [smem:[#allocation5 + %s1320_s23]]  ;;  %s76_s27 = scalar_lea.vmem [#allocation2], %s1320_s23  ;;  %s1320_s23 = sphi %s1318_s23, %s72_s23  }
  0x1c   : > { %s1769_s3 = sld [smem:[#allocation12_spill]] }
  0x22   : > { %s75_s26 = scalar_lea.vmem %s1769_s3, %s74_s24 }
  0x23   : > { %v95_v1 = vld [vmem:[%s75_s26] sm:$0x1] }
  0x24   : > { %96 = vst [vmem:[%s76_s27] sm:$0x1] %v95_v1 }
  0x25   : > { %122 = vsyncadd [#allocation3], 16  ;;  %s72_s23 = sadd.s32 1, %s1320_s23  }
  0x26   : > { %p69_p5 = scmp.ge.s32.totalorder %s72_s23, 8  }
  0x27   :  { %s1770_s29 = sld [smem:[#allocation13_spill]] (%p69_p5)  ;;  %vm132_vm0 = vcmask (%p69_p5), 64512   ;;  %v1327_v4 = vmov (%p69_p5), 0.0   ;;  %vm1328_vm1 = vmmov (%p69_p5), 0   ;;  %v1020_v5 = vld [vmem:[%s1746_s4] ss:$0 sm:$0xff] (%p69_p5) }
  0x28   :  { %71 = sbr.rel (!%p69_p5) target bundleno = 27 (0x1b), region = 154  ;;  %s1771_s20 = sld [smem:[#allocation11_spill]] (%p69_p5)  ;;  %1137 = vmatprep.subr.mxu1 (%p69_p5), %v1327_v4  ;;  %1139 = vmatprep.mubr.msk.f32.mxu1 (%p69_p5), %vm1328_vm1, %v1327_v4 }
  0x29   :  { %s1322_s22 = smov (%p69_p5), 0  }
  0x2d   :  { %v124_v2 = vld [vmem:[%s1770_s29] sm:$0xff] }
  0x2e   :  { %v123_v3 = vld [vmem:[%s1771_s20] sm:$0xff]  ;;  %1138 = vmatpush3.msra.mxu1 %v124_v2 }
  0x2f   :  { %1140 = vmatmul.mubr.msk.f32.vlgmr.msra.gmra.mxu1 %vm132_vm0, %v123_v3 }
  0xef   :  { %v202_v6 = vpop.f32.mrf.mxu1 }
  0xf0   :  { %v203_v7 = vadd.f32 %v1020_v5, %v202_v6 }
  0xf1   :  { %v1141_v8 = vpop.f32.mrf.mxu1 }
  0xf2 LB: > { %1316 = dma.done.wait [#allocation3], 16  ;;  %s1324_s22 = sphi %s1322_s22, %s211_s22  }
  0xf3   : > { %1317 = vsyncadd [#allocation3], 4294967280  ;;  %s211_s22 = sadd.s32 1, %s1324_s22  }
  0xf4   : > { %p208_p6 = scmp.ge.s32.totalorder %s211_s22, 8  }
  0xf5   :  { %1142 = vmatprep.subr.mxu1 (%p208_p6), %v1327_v4  ;;  %v220_v9 = vld [vmem:[%s1747_s5 + $0x18] sm:$0xff] (%p208_p6)  ;;  %v219_v10 = vld [vmem:[%s1747_s5 + $0x10] sm:$0xff] (%p208_p6)  ;;  %1150 = vmatprep.mubr.msk.f32.mxu1 (%p208_p6), %vm1328_vm1, %v1327_v4  ;;  %v215_v11 = vld [vmem:[#allocation2] sm:$0xff] (%p208_p6)  ;;  %vm228_vm2 = vcmask (%p208_p6), 261120   ;;  %s1772_s20 = sld [smem:[#allocation14_spill]] (%p208_p6)  ;;  %vm974_vm3 = vcmask (%p208_p6), 130048  }
  0xf6   :  { %210 = sbr.rel (!%p208_p6) target bundleno = 242 (0xf2), region = 165  ;;  %1143 = vmatpush3.msra.mxu1 (%p208_p6), %v220_v9  ;;  %1153 = vmatprep.subr.mxu0 (%p208_p6), %v1327_v4  ;;  %v218_v12 = vld [vmem:[%s1747_s5 + $0x8] sm:$0xff] (%p208_p6)  ;;  %v217_v13 = vld [vmem:[%s1747_s5] sm:$0xff] (%p208_p6)  ;;  %v216_v14 = vadd.f32 (%p208_p6), %v215_v11, %v203_v7  ;;  %v338_v23 = vld [vmem:[%s1751_s9 + $0x18] sm:$0xff] (%p208_p6)  ;;  %vm986_vm4 = vcmask (%p208_p6), 7168  }
  0xf7   :  { %1144 = vmatprep.subr.mxu1 (%p208_p6), %v1327_v4  ;;  %1161 = vmatprep.mubr.msk.f32.mxu0 (%p208_p6), %vm1328_vm1, %v1327_v4  ;;  %v1022_v15 = vld [vmem:[%s1748_s6] ss:$0 sm:$0xff] (%p208_p6)  ;;  %v337_v24 = vld [vmem:[%s1751_s9 + $0x10] sm:$0xff] (%p208_p6)  ;;  %v336_v25 = vld [vmem:[%s1751_s9 + $0x8] sm:$0xff] (%p208_p6) }
  0xf8   :  { %1145 = vmatpush3.msra.mxu1 (%p208_p6), %v219_v10  ;;  %1154 = vmatpush3.msra.mxu0 (%p208_p6), %v338_v23  ;;  %v335_v26 = vld [vmem:[%s1751_s9] sm:$0xff] (%p208_p6)  ;;  %v435_v27 = vld [vmem:[%s1753_s11 + $0x78] sm:$0xff] (%p208_p6)  ;;  %v434_v28 = vld [vmem:[%s1753_s11 + $0x70] sm:$0xff] (%p208_p6) }
  0xf9   :  { %1146 = vmatprep.subr.mxu1 (%p208_p6), %v1327_v4  ;;  %1155 = vmatprep.subr.mxu0 (%p208_p6), %v1327_v4  ;;  %v433_v29 = vld [vmem:[%s1753_s11 + $0x68] sm:$0xff] (%p208_p6)  ;;  %v432_v30 = vld [vmem:[%s1753_s11 + $0x60] sm:$0xff] (%p208_p6)  ;;  %v431_v31 = vld [vmem:[%s1753_s11 + $0x58] sm:$0xff] (%p208_p6) }
  0xfa   :  { %1147 = vmatpush3.msra.mxu1 (%p208_p6), %v218_v12  ;;  %1156 = vmatpush3.msra.mxu0 (%p208_p6), %v337_v24  ;;  %v430_v32 = vld [vmem:[%s1753_s11 + $0x50] sm:$0xff] (%p208_p6)  ;;  %v429_v33 = vld [vmem:[%s1753_s11 + $0x48] sm:$0xff] (%p208_p6)  ;;  %v428_v34 = vld [vmem:[%s1753_s11 + $0x40] sm:$0xff] (%p208_p6) }
  0xfb   :  { %1148 = vmatprep.subr.mxu1 %v1327_v4  ;;  %1157 = vmatprep.subr.mxu0 %v1327_v4  ;;  %v427_v35 = vld [vmem:[%s1753_s11 + $0x38] sm:$0xff]  ;;  %v426_v36 = vld [vmem:[%s1753_s11 + $0x30] sm:$0xff]  ;;  %v425_v37 = vld [vmem:[%s1753_s11 + $0x28] sm:$0xff] }
  0xfc   :  { %1149 = vmatpush3.msra.mxu1 %v217_v13  ;;  %1158 = vmatpush3.msra.mxu0 %v336_v25  ;;  %v424_v38 = vld [vmem:[%s1753_s11 + $0x20] sm:$0xff]  ;;  %v423_v39 = vld [vmem:[%s1753_s11 + $0x18] sm:$0xff]  ;;  %v422_v54 = vld [vmem:[%s1753_s11 + $0x10] sm:$0xff] }
  0xfd   :  { %1151 = vmatmul.mubr.msk.f32.vlgmr.msra.gmra.mxu1 %vm228_vm2, %v216_v14  ;;  %1164 = vmatprep.subr.mxu1 %v1327_v4  ;;  %v1024_v49 = vld [vmem:[%s1749_s7] ss:$0 sm:$0xff]  ;;  %v421_v55 = vld [vmem:[%s1753_s11 + $0x8] sm:$0xff]  ;;  %v1034_v7 = vld [vmem:[%s1747_s5 + $0x38] sm:$0xff] }
  0xfe   :  { %1196 = vmatprep.mubr.msk.f32.mxu1 %vm1328_vm1, %v1327_v4  ;;  %1159 = vmatprep.subr.mxu0 %v1327_v4  ;;  %v1025_v51 = vld [vmem:[%s1750_s8] ss:$0 sm:$0xff]  ;;  %v1033_v8 = vld [vmem:[%s1747_s5 + $0x30] sm:$0xff]  ;;  %v1032_v9 = vld [vmem:[%s1747_s5 + $0x28] sm:$0xff] }
  0xff   :  { %1160 = vmatpush3.msra.mxu0 %v335_v26  ;;  %1165 = vmatpush3.msra.mxu1 %v435_v27  ;;  %v420_v56 = vld [vmem:[%s1753_s11] sm:$0xff] }
 0x100   :  { %1199 = vmatprep.subr.mxu0 %v1327_v4  ;;  %1166 = vmatprep.subr.mxu1 %v1327_v4  ;;  %v1026_v57 = vld [vmem:[%s1752_s10] ss:$0 sm:$0xff]  ;;  %v1036_v25 = vld [vmem:[%s1748_s6 + $0x1] ss:$0 sm:$0xff] }
 0x101   :  { %1167 = vmatpush3.msra.mxu1 %v434_v28  ;;  %v1028_v62 = vld [vmem:[%s1754_s12] ss:$0 sm:$0xff] }
 0x102   :  { %1168 = vmatprep.subr.mxu1 %v1327_v4  ;;  %v1031_v10 = vld [vmem:[%s1747_s5 + $0x20] sm:$0xff] }
 0x103   :  { %1169 = vmatpush3.msra.mxu1 %v433_v29 }
 0x104   :  { %1170 = vmatprep.subr.mxu1 %v1327_v4 }
 0x105   :  { %1171 = vmatpush3.msra.mxu1 %v432_v30 }
 0x106   :  { %1172 = vmatprep.subr.mxu1 %v1327_v4 }
 0x107   :  { %1173 = vmatpush3.msra.mxu1 %v431_v31 }
 0x108   :  { %1174 = vmatprep.subr.mxu1 %v1327_v4 }
 0x109   :  { %1175 = vmatpush3.msra.mxu1 %v430_v32 }
 0x10a   :  { %1176 = vmatprep.subr.mxu1 %v1327_v4 }
 0x10b   :  { %1177 = vmatpush3.msra.mxu1 %v429_v33  ;;  %v1045_v33 = vld [vmem:[%s1751_s9 + $0x38] sm:$0xff] }
 0x10c   :  { %1178 = vmatprep.subr.mxu1 %v1327_v4 }
 0x10d   :  { %1179 = vmatpush3.msra.mxu1 %v428_v34  ;;  %v1044_v34 = vld [vmem:[%s1751_s9 + $0x30] sm:$0xff] }
 0x10e   :  { %1180 = vmatprep.subr.mxu1 %v1327_v4 }
 0x10f   :  { %1181 = vmatpush3.msra.mxu1 %v427_v35  ;;  %v1043_v35 = vld [vmem:[%s1751_s9 + $0x28] sm:$0xff] }
 0x110   :  { %1182 = vmatprep.subr.mxu1 %v1327_v4 }
 0x111   :  { %1183 = vmatpush3.msra.mxu1 %v426_v36  ;;  %v1042_v36 = vld [vmem:[%s1751_s9 + $0x20] sm:$0xff] }
 0x112   :  { %1184 = vmatprep.subr.mxu1 %v1327_v4 }
 0x113   :  { %1185 = vmatpush3.msra.mxu1 %v425_v37 }
 0x114   :  { %1186 = vmatprep.subr.mxu1 %v1327_v4 }
 0x115   :  { %1187 = vmatpush3.msra.mxu1 %v424_v38 }
 0x116   :  { %1188 = vmatprep.subr.mxu1 %v1327_v4 }
 0x117   :  { %1189 = vmatpush3.msra.mxu1 %v423_v39 }
 0x118   :  { %1190 = vmatprep.subr.mxu1 %v1327_v4 }
 0x119   :  { %1191 = vmatpush3.msra.mxu1 %v422_v54  ;;  %v1061_v54 = vld [vmem:[%s1753_s11 + $0xe0] sm:$0xff] }
 0x11a   :  { %1192 = vmatprep.subr.mxu1 %v1327_v4 }
 0x11b   :  { %1193 = vmatpush3.msra.mxu1 %v421_v55  ;;  %v1060_v55 = vld [vmem:[%s1753_s11 + $0xd8] sm:$0xff] }
 0x11c   :  { %1194 = vmatprep.subr.mxu1 %v1327_v4 }
 0x11d   :  { %1195 = vmatpush3.msra.mxu1 %v420_v56  ;;  %v1059_v56 = vld [vmem:[%s1753_s11 + $0xd0] sm:$0xff] }
 0x11e   :  { %1256 = vmatprep.subr.mxu1 %v1327_v4 }
 0x1bd   :  { %v298_v16 = vpop.f32.mrf.mxu1 }
 0x1be   :  { %v299_v17 = vadd.f32 %v1022_v15, %v298_v16 }
 0x1bf   :  { %v1152_v18 = vpop.f32.mrf.mxu1 }
 0x1c0   :  { %v1478_v19 = vadd.f32 %v299_v17, %v216_v14 }
 0x1c2   :  { %v305_v20 = vsel %vm228_vm2, %v1478_v19, 0.0  ;;  %v310_v21 = vmul.f32 %v1478_v19, %v1478_v19 }
 0x1c3   :  { %306 = vadd.xlane.f32.xlu0 %v305_v20  ;;  %v1029_v20 = vld [vmem:[%s1772_s20] ss:$0 sm:$0xff] }
 0x1c4   :  { %v311_v22 = vsel %vm228_vm2, %v310_v21, 0.0 }
 0x1c7   :  { %312 = vadd.xlane.f32.xlu0 %v311_v22  ;;  %v1030_v22 = vld [vmem:[%s1756_s14] ss:$0 sm:$0xff] }
 0x24c   :  { %v307_v40 = vpop.xlane.xlu0 %306 }
 0x24d   :  { %v309_v41 = vmul.f32 0.03125, %v307_v40 }
 0x24f   :  { %v315_v43 = vmul.f32 %v309_v41, %v309_v41  ;;  %v317_v47 = vsub.f32 %v1478_v19, %v309_v41 }
 0x250   :  { %v313_v42 = vpop.xlane.xlu0 %312 }
 0x251   :  { %v314_v44 = vmul.f32 0.03125, %v313_v42 }
 0x253   :  { %v316_v45 = vsub.f32 %v314_v44, %v315_v43 }
 0x255   :  { %v318_v46 = vadd.f32 1e-05, %v316_v45 }
 0x257   :  { %1286 = vrsqrt.f32 %v318_v46  ;;  %v1040_v46 = vld [vmem:[%s1749_s7 + $0x1] ss:$0 sm:$0xff] }
 0x264   :  { %v1287_v48 = vpop.eup %1286 }
 0x265   :  { %v320_v50 = vmul.f32 %v1287_v48, %v317_v47  ;;  %v1041_v48 = vld [vmem:[%s1750_s8 + $0x1] ss:$0 sm:$0xff] }
 0x267   :  { %v327_v52 = vmul.f32 %v1024_v49, %v320_v50 }
 0x269   :  { %v334_v53 = vadd.f32 %v1025_v51, %v327_v52  ;;  %v1064_v51 = vld [vmem:[%s1753_s11 + $0xf8] sm:$0xff]  ;;  %v1063_v52 = vld [vmem:[%s1753_s11 + $0xf0] sm:$0xff] }
 0x26b   :  { %1162 = vmatmul.mubr.msk.f32.vlgmr.msra.gmra.mxu0 %vm228_vm2, %v334_v53 }
 0x26c   :  { %1207 = vmatprep.mubr.msk.f32.mxu0 %vm1328_vm1, %v1327_v4  ;;  %1200 = vmatpush3.msra.mxu0 %v1034_v7 }
 0x26d   :  { %1201 = vmatprep.subr.mxu0 %v1327_v4 }
 0x26e   :  { %1202 = vmatpush3.msra.mxu0 %v1033_v8 }
 0x26f   :  { %1203 = vmatprep.subr.mxu0 %v1327_v4 }
 0x270   :  { %1204 = vmatpush3.msra.mxu0 %v1032_v9  ;;  %v1066_v9 = vld [vmem:[%s1754_s12 + $0x1] ss:$0 sm:$0xff] }
 0x271   :  { %1205 = vmatprep.subr.mxu0 %v1327_v4 }
 0x272   :  { %1206 = vmatpush3.msra.mxu0 %v1031_v10 }
 0x273   :  { %1210 = vmatprep.subr.mxu0 %v1327_v4 }
 0x32b   :  { %v415_v58 = vpop.f32.mrf.mxu0 }
 0x32c   :  { %v416_v59 = vadd.f32 %v1026_v57, %v415_v58  ;;  %v1058_v57 = vld [vmem:[%s1753_s11 + $0xc8] sm:$0xff]  ;;  %v1057_v58 = vld [vmem:[%s1753_s11 + $0xc0] sm:$0xff] }
 0x32d   :  { %v1163_v60 = vpop.f32.mrf.mxu0 }
 0x32e   :  { %v419_v61 = vmax.f32 %v416_v59, 0.0  ;;  %v1056_v59 = vld [vmem:[%s1753_s11 + $0xb8] sm:$0xff]  ;;  %v1055_v60 = vld [vmem:[%s1753_s11 + $0xb0] sm:$0xff] }
 0x330   :  { %1197 = vmatmul.mubr.f32.vlgmr.msra.gmra.mxu1 %v419_v61  ;;  %v1054_v61 = vld [vmem:[%s1753_s11 + $0xa8] sm:$0xff] }
 0x331   :  { %1264 = vmatprep.mubr.msk.f32.mxu1 %vm1328_vm1, %v1327_v4 }
 0x3f0   :  { %v509_v63 = vpop.f32.mrf.mxu1 }
 0x3f1   :  { %v510_v0 = vadd.f32 %v1028_v62, %v509_v63  ;;  %v1053_v62 = vld [vmem:[%s1753_s11 + $0xa0] sm:$0xff]  ;;  %v1052_v63 = vld [vmem:[%s1753_s11 + $0x98] sm:$0xff] }
 0x3f2   :  { %v1198_v1 = vpop.f32.mrf.mxu1 }
 0x3f3   :  { %v513_v2 = vadd.f32 %v510_v0, %v334_v53  ;;  %v1062_v53 = vld [vmem:[%s1753_s11 + $0xe8] sm:$0xff]  ;;  %v1051_v0 = vld [vmem:[%s1753_s11 + $0x90] sm:$0xff] }
 0x3f4   :  { %v1050_v1 = vld [vmem:[%s1753_s11 + $0x88] sm:$0xff] }
 0x3f5   :  { %v516_v3 = vsel %vm228_vm2, %v513_v2, 0.0  ;;  %v520_v5 = vmul.f32 %v513_v2, %v513_v2 }
 0x3f6   :  { %517 = vadd.xlane.f32.xlu1 %v516_v3  ;;  %v1047_v3 = vld [vmem:[%s1752_s10 + $0x1] ss:$0 sm:$0xff] }
 0x3f7   :  { %v521_v6 = vsel %vm228_vm2, %v520_v5, 0.0 }
 0x3fa   :  { %522 = vadd.xlane.f32.xlu1 %v521_v6 }
 0x47f   :  { %v518_v11 = vpop.xlane.xlu1 %517 }
 0x480   :  { %v519_v12 = vmul.f32 0.03125, %v518_v11 }
 0x482   :  { %v525_v14 = vmul.f32 %v519_v12, %v519_v12  ;;  %v527_v18 = vsub.f32 %v513_v2, %v519_v12  ;;  %v1049_v2 = vld [vmem:[%s1753_s11 + $0x80] sm:$0xff] }
 0x483   :  { %v523_v13 = vpop.xlane.xlu1 %522 }
 0x484   :  { %v524_v15 = vmul.f32 0.03125, %v523_v13 }
 0x486   :  { %v526_v16 = vsub.f32 %v524_v15, %v525_v14 }
 0x488   :  { %v528_v17 = vadd.f32 1e-05, %v526_v16 }
 0x48a   :  { %1288 = vrsqrt.f32 %v528_v17  ;;  %v884_v17 = vld [vmem:[%s1757_s15 + $0x18] sm:$0xff] }
 0x48b   :  { %1257 = vmatpush3.msra.mxu1 %v884_v17 }
 0x48c   :  { %1258 = vmatprep.subr.mxu1 %v1327_v4 }
 0x497   :  { %v1289_v19 = vpop.eup %1288 }
 0x498   :  { %v530_v21 = vmul.f32 %v1289_v19, %v527_v18  ;;  %v883_v18 = vld [vmem:[%s1757_s15 + $0x10] sm:$0xff]  ;;  %v882_v19 = vld [vmem:[%s1757_s15 + $0x8] sm:$0xff] }
 0x499   :  { %1259 = vmatpush3.msra.mxu1 %v883_v18 }
 0x49a   :  { %v537_v23 = vmul.f32 %v1029_v20, %v530_v21  ;;  %1260 = vmatprep.subr.mxu1 %v1327_v4  ;;  %v881_v20 = vld [vmem:[%s1757_s15] sm:$0xff] }
 0x49b   :  { %1261 = vmatpush3.msra.mxu1 %v882_v19 }
 0x49c   :  { %v544_v24 = vadd.f32 %v1030_v22, %v537_v23  ;;  %1262 = vmatprep.subr.mxu1 %v1327_v4 }
 0x49d   :  { %1263 = vmatpush3.msra.mxu1 %v881_v20 }
 0x49e   :  { %1208 = vmatmul.mubr.msk.f32.vlgmr.msra.gmra.mxu0 %vm228_vm2, %v544_v24 }
 0x49f   :  { %1218 = vmatprep.mubr.msk.f32.mxu0 %vm1328_vm1, %v1327_v4  ;;  %1211 = vmatpush3.msra.mxu0 %v1045_v33 }
 0x4a0   :  { %1212 = vmatprep.subr.mxu0 %v1327_v4 }
 0x4a1   :  { %1213 = vmatpush3.msra.mxu0 %v1044_v34  ;;  %v1071_v34 = vld [vmem:[%s1758_s16] ss:$0 sm:$0xff] }
 0x4a2   :  { %1214 = vmatprep.subr.mxu0 %v1327_v4 }
 0x4a3   :  { %1215 = vmatpush3.msra.mxu0 %v1043_v35 }
 0x4a4   :  { %1216 = vmatprep.subr.mxu0 %v1327_v4 }
 0x4a5   :  { %1217 = vmatpush3.msra.mxu0 %v1042_v36 }
 0x4a6   :  { %1221 = vmatprep.subr.mxu0 %v1327_v4 }
 0x55e   :  { %v627_v26 = vpop.f32.mrf.mxu0 }
 0x55f   :  { %v628_v27 = vadd.f32 %v1036_v25, %v627_v26 }
 0x560   :  { %v1209_v28 = vpop.f32.mrf.mxu0 }
 0x561   :  { %v631_v29 = vadd.f32 %v628_v27, %v544_v24 }
 0x563   :  { %v636_v30 = vsel %vm228_vm2, %v631_v29, 0.0  ;;  %v640_v31 = vmul.f32 %v631_v29, %v631_v29 }
 0x564   :  { %637 = vadd.xlane.f32.xlu0 %v636_v30  ;;  %v1069_v30 = vld [vmem:[%s1772_s20 + $0x1] ss:$0 sm:$0xff] }
 0x565   :  { %v641_v32 = vsel %vm228_vm2, %v640_v31, 0.0 }
 0x566   :  { %642 = vadd.xlane.f32.xlu1 %v641_v32 }
 0x5ed   :  { %v638_v37 = vpop.xlane.xlu0 %637 }
 0x5ee   :  { %v639_v38 = vmul.f32 0.03125, %v638_v37 }
 0x5ef   :  { %v643_v39 = vpop.xlane.xlu1 %642 }
 0x5f0   :  { %v645_v40 = vmul.f32 %v639_v38, %v639_v38  ;;  %v644_v41 = vmul.f32 0.03125, %v643_v39  ;;  %v647_v44 = vsub.f32 %v631_v29, %v639_v38  ;;  %v1073_v38 = vld [vmem:[%s1759_s17] ss:$0 sm:$0xff] }
 0x5f2   :  { %v646_v42 = vsub.f32 %v644_v41, %v645_v40 }
 0x5f4   :  { %v648_v43 = vadd.f32 1e-05, %v646_v42  ;;  %v1074_v42 = vld [vmem:[#allocation6] ss:$0 sm:$0xff] }
 0x5f6   :  { %1290 = vrsqrt.f32 %v648_v43 }
 0x603   :  { %v1291_v45 = vpop.eup %1290 }
 0x604   :  { %v650_v47 = vmul.f32 %v1291_v45, %v647_v44 }
 0x606   :  { %v657_v49 = vmul.f32 %v1040_v46, %v650_v47 }
 0x608   :  { %v664_v50 = vadd.f32 %v1041_v48, %v657_v49 }
 0x60a   :  { %1219 = vmatmul.mubr.msk.f32.vlgmr.msra.gmra.mxu0 %vm228_vm2, %v664_v50 }
 0x60b   :  { %1222 = vmatpush3.msra.mxu0 %v1064_v51  ;;  %1253 = vmatprep.mubr.msk.f32.mxu0 %vm1328_vm1, %v1327_v4 }
 0x60c   :  { %1223 = vmatprep.subr.mxu0 %v1327_v4 }
 0x60d   :  { %1224 = vmatpush3.msra.mxu0 %v1063_v52 }
 0x60e   :  { %1225 = vmatprep.subr.mxu0 %v1327_v4 }
 0x60f   :  { %1226 = vmatpush3.msra.mxu0 %v1062_v53 }
 0x610   :  { %1227 = vmatprep.subr.mxu0 %v1327_v4 }
 0x611   :  { %1228 = vmatpush3.msra.mxu0 %v1061_v54 }
 0x612   :  { %1229 = vmatprep.subr.mxu0 %v1327_v4 }
 0x613   :  { %1230 = vmatpush3.msra.mxu0 %v1060_v55 }
 0x614   :  { %1231 = vmatprep.subr.mxu0 %v1327_v4 }
 0x615   :  { %1232 = vmatpush3.msra.mxu0 %v1059_v56 }
 0x616   :  { %1233 = vmatprep.subr.mxu0 %v1327_v4 }
 0x617   :  { %1234 = vmatpush3.msra.mxu0 %v1058_v57 }
 0x618   :  { %1235 = vmatprep.subr.mxu0 %v1327_v4 }
 0x619   :  { %1236 = vmatpush3.msra.mxu0 %v1057_v58 }
 0x61a   :  { %1237 = vmatprep.subr.mxu0 %v1327_v4 }
 0x61b   :  { %1238 = vmatpush3.msra.mxu0 %v1056_v59 }
 0x61c   :  { %1239 = vmatprep.subr.mxu0 %v1327_v4 }
 0x61d   :  { %1240 = vmatpush3.msra.mxu0 %v1055_v60 }
 0x61e   :  { %1241 = vmatprep.subr.mxu0 %v1327_v4 }
 0x61f   :  { %1242 = vmatpush3.msra.mxu0 %v1054_v61 }
 0x620   :  { %1243 = vmatprep.subr.mxu0 %v1327_v4 }
 0x621   :  { %1244 = vmatpush3.msra.mxu0 %v1053_v62 }
 0x622   :  { %1245 = vmatprep.subr.mxu0 %v1327_v4 }
 0x623   :  { %1246 = vmatpush3.msra.mxu0 %v1052_v63 }
 0x624   :  { %1247 = vmatprep.subr.mxu0 %v1327_v4 }
 0x625   :  { %1248 = vmatpush3.msra.mxu0 %v1051_v0 }
 0x626   :  { %1249 = vmatprep.subr.mxu0 %v1327_v4 }
 0x627   :  { %1250 = vmatpush3.msra.mxu0 %v1050_v1 }
 0x628   :  { %1251 = vmatprep.subr.mxu0 %v1327_v4  ;;  %v1070_v4 = vld [vmem:[%s1756_s14 + $0x1] ss:$0 sm:$0xff] }
 0x629   :  { %1252 = vmatpush3.msra.mxu0 %v1049_v2 }
 0x6ca   :  { %v747_v5 = vpop.f32.mrf.mxu0 }
 0x6cb   :  { %v748_v6 = vadd.f32 %v1047_v3, %v747_v5 }
 0x6cc   :  { %v1220_v7 = vpop.f32.mrf.mxu0 }
 0x6cd   :  { %v751_v8 = vmax.f32 %v748_v6, 0.0 }
 0x6cf   :  { %1254 = vmatmul.mubr.f32.vlgmr.msra.gmra.mxu0 %v751_v8 }
 0x78f   :  { %v843_v10 = vpop.f32.mrf.mxu0 }
 0x790   :  { %v844_v11 = vadd.f32 %v1066_v9, %v843_v10 }
 0x791   :  { %v1255_v12 = vpop.f32.mrf.mxu0 }
 0x792   :  { %v847_v13 = vadd.f32 %v844_v11, %v664_v50 }
 0x794   :  { %v852_v14 = vsel %vm228_vm2, %v847_v13, 0.0  ;;  %v856_v15 = vmul.f32 %v847_v13, %v847_v13 }
 0x795   :  { %853 = vadd.xlane.f32.xlu0 %v852_v14 }
 0x796   :  { %v857_v16 = vsel %vm228_vm2, %v856_v15, 0.0 }
 0x797   :  { %858 = vadd.xlane.f32.xlu1 %v857_v16 }
 0x81e   :  { %v854_v21 = vpop.xlane.xlu0 %853 }
 0x81f   :  { %v855_v22 = vmul.f32 0.03125, %v854_v21 }
 0x820   :  { %v859_v23 = vpop.xlane.xlu1 %858 }
 0x821   :  { %v861_v24 = vmul.f32 %v855_v22, %v855_v22  ;;  %v860_v25 = vmul.f32 0.03125, %v859_v23  ;;  %v863_v28 = vsub.f32 %v847_v13, %v855_v22 }
 0x823   :  { %v862_v26 = vsub.f32 %v860_v25, %v861_v24 }
 0x825   :  { %v864_v27 = vadd.f32 1e-05, %v862_v26 }
 0x827   :  { %1292 = vrsqrt.f32 %v864_v27 }
 0x834   :  { %v1293_v29 = vpop.eup %1292 }
 0x835   :  { %v866_v31 = vmul.f32 %v1293_v29, %v863_v28 }
 0x837   :  { %v873_v32 = vmul.f32 %v1069_v30, %v866_v31 }
 0x839   :  { %v880_v33 = vadd.f32 %v1070_v4, %v873_v32 }
 0x83b   :  { %1265 = vmatmul.mubr.msk.f32.vlgmr.msra.gmra.mxu1 %vm228_vm2, %v880_v33 }
 0x8fb   :  { %v961_v35 = vpop.f32.mrf.mxu1 }
 0x8fc   :  { %v962_v36 = vadd.f32 %v1071_v34, %v961_v35 }
 0x8fd   :  { %v1266_v37 = vpop.f32.mrf.mxu1 }
 0x8fe   :  { %v965_v39 = vmax.f32 %v962_v36, 0.0 }
 0x900   :  { %v973_v40 = vmul.f32 %v1073_v38, %v965_v39 }
 0x902   :  { %v975_v41 = vsel %vm974_vm3, %v973_v40, 0.0 }
 0x903   :  { %976 = vadd.xlane.f32.xlu0 %v975_v41 }
 0x98c   :  { %v977_v43 = vpop.xlane.xlu0 %976 }
 0x98d   :  { %v985_v44 = vadd.f32 %v1074_v42, %v977_v43 }
 0x98f   :  { %987 = vst.msk [vmem:[%s1760_s19] sm:$0xff] %vm986_vm4, %v985_v44 }
 0x990   :  { %992 = vsyncmov [#allocation3] }
 0x993   :  { %s993_s16 = vpop.sfrf %992 }
 0x994   :  { %p1075_p7 = scmp.ne.s32.totalorder %s993_s16, 0 }
 0x996   :  { %997 = shalt.err (%p1075_p7)  }

</bundles_post_ra>
